<compile_context>
chip_gen: v5e
topology: v5e:2x2
jax: 0.10.0
libtpu: 0.0.40
codegen_flags: <defaults>
</compile_context>

<pallas_src>
import jax
import jax.numpy as jnp
from jax.experimental import pallas as pl
from jax.experimental.pallas import tpu as pltpu


# ----------------------------- model sizes ---------------------------------
INPUT_DIM = 3        # "3dim" problem
HIDDEN_DIM = 32      # config['model']['hidden_dim']
NUM_LAYERS = 2       # config['model']['num_layers'] -> one hidden Softplus block
BATCH = 8
T_POINTS = 8         # number of time points (T_POINTS - 1 Euler steps)


def _softplus(x):
    # numerically-stable softplus, identical formula in kernel & reference
    return jnp.log1p(jnp.exp(-jnp.abs(x))) + jnp.maximum(x, 0.0)


def _mlp(y, w1, b1, w2, b2, w3, b3):
    h = jnp.tanh(jnp.dot(y, w1, preferred_element_type=jnp.float32) + b1)
    h = _softplus(jnp.dot(h, w2, preferred_element_type=jnp.float32) + b2)
    return jnp.dot(h, w3, preferred_element_type=jnp.float32) + b3


# ------------------------------ Pallas kernel -------------------------------
def cneural_ode_kernel(coef_ref, y0_ref, w1_ref, w2_ref, w3_ref, b_ref, out_ref):
    """Single invocation: whole Euler time loop runs in-kernel (unrolled).

    coef_ref : SMEM (n_steps+1,) f32  -- coef[0]=dt, coef[1+i]=sin(t_i)*dt
    y0_ref   : VMEM (B, D)
    w1_ref   : VMEM (D, 2H)    [wf1 | wg1]
    w2_ref   : VMEM (2H, 2H)   blockdiag(wf2, wg2)
    w3_ref   : VMEM (2H, 2D)   blockdiag(wf3, wg3)
    b_ref    : VMEM (3, 2H)    rows: [bf1|bg1], [bf2|bg2], [bf3|bg3, 0-pad]
    out_ref  : VMEM (B, D)
    """
    B, D = y0_ref.shape
    two_H = w1_ref.shape[1]
    two_D = 2 * D
    n_steps = coef_ref.shape[0] - 1

    # Hoist weight loads and bias broadcasts out of the time loop.
    w1 = w1_ref[...]
    w2 = w2_ref[...]
    w3 = w3_ref[...]
    bias = b_ref[...]
    b1 = jnp.broadcast_to(bias[0:1, :], (B, two_H))
    b2 = jnp.broadcast_to(bias[1:2, :], (B, two_H))
    b3 = jnp.broadcast_to(bias[2:3, :two_D], (B, two_D))

    dt = coef_ref[0]

    def euler_step(i, y):
        u_dt = coef_ref[i + 1]                       # sin(t_i) * dt, precomputed
        h = jnp.tanh(jnp.dot(y, w1, preferred_element_type=jnp.float32) + b1)
        h = _softplus(jnp.dot(h, w2, preferred_element_type=jnp.float32) + b2)
        o = jnp.dot(h, w3, preferred_element_type=jnp.float32) + b3
        f = o[:, :D]                                 # func_f output
        g = o[:, D:]                                 # func_g output
        return y + f * dt + g * u_dt

    y0 = y0_ref[...].astype(jnp.float32)
    y_final = jax.lax.fori_loop(0, n_steps, euler_step, y0, unroll=True)
    out_ref[...] = y_final.astype(out_ref.dtype)


# ------------------------------ param packing --------------------------------
def _pack_params(params_f, params_g):
    """Fuse func_f and func_g into one double-width MLP (done once, in XLA)."""
    wf1, bf1, wf2, bf2, wf3, bf3 = params_f
    wg1, bg1, wg2, bg2, wg3, bg3 = params_g
    D, H = wf1.shape

    zHH = jnp.zeros((H, H), jnp.float32)
    zHD = jnp.zeros((H, D), jnp.float32)

    W1 = jnp.concatenate([wf1, wg1], axis=1)                              # (D, 2H)
    W2 = jnp.concatenate(
        [jnp.concatenate([wf2, zHH], axis=1),
         jnp.concatenate([zHH, wg2], axis=1)], axis=0)                    # (2H, 2H)
    W3 = jnp.concatenate(
        [jnp.concatenate([wf3, zHD], axis=1),
         jnp.concatenate([zHD, wg3], axis=1)], axis=0)                    # (2H, 2D)

    Bpack = jnp.zeros((3, 2 * H), jnp.float32)
    Bpack = Bpack.at[0, :].set(jnp.concatenate([bf1, bg1], axis=1)[0])
    Bpack = Bpack.at[1, :].set(jnp.concatenate([bf2, bg2], axis=1)[0])
    Bpack = Bpack.at[2, :2 * D].set(jnp.concatenate([bf3, bg3], axis=1)[0])
    return W1, W2, W3, Bpack


# ------------------------------- wrapper --------------------------------------
@jax.jit
def cneural_ode_forward(y0, t, params_f, params_g):
    """y0: (B, 1, D) float32;  t: (T,) float32.  Returns (B, 1, D)."""
    B, one, D = y0.shape
    assert one == 1
    y0_flat = y0.reshape(B, D).astype(jnp.float32)

    W1, W2, W3, Bpack = _pack_params(params_f, params_g)

    # Per-step scalar coefficients precomputed outside the kernel:
    #   coef[0]   = dt  (basic_euler_ode_solver uses fixed dt = t[1]-t[0])
    #   coef[1+i] = u(t_i) * dt = sin(t_i) * dt
    dt = t[1] - t[0]
    u_dt = jnp.sin(t[:-1]) * dt
    coef = jnp.concatenate([dt[None], u_dt]).astype(jnp.float32)

    smem = pl.BlockSpec(memory_space=pltpu.MemorySpace.SMEM)
    vmem = pl.BlockSpec(memory_space=pltpu.MemorySpace.VMEM)

    out = pl.pallas_call(
        cneural_ode_kernel,
        out_shape=jax.ShapeDtypeStruct((B, D), jnp.float32),
        in_specs=[smem, vmem, vmem, vmem, vmem, vmem],
        out_specs=vmem,
    )(coef, y0_flat, W1, W2, W3, Bpack)

    return out.reshape(B, 1, D)


# ------------------------- deterministic parameters --------------------------
def init_odefunc_params(key, input_dim, hidden_dim):
    """Mimics nn.Linear default init: U(-1/sqrt(fan_in), 1/sqrt(fan_in)).

    Weights are stored as (in, out) so the kernel computes x @ W + b.
    Biases are stored as (1, out) 2-D slabs.
    """
    ks = jax.random.split(key, 6)

    def lin(kw, kb, fan_in, fan_out):
        bound = 1.0 / jnp.sqrt(fan_in)
        w = jax.random.uniform(kw, (fan_in, fan_out), jnp.float32, -bound, bound)
        b = jax.random.uniform(kb, (1, fan_out), jnp.float32, -bound, bound)
        return w, b

    w1, b1 = lin(ks[0], ks[1], input_dim, hidden_dim)
    w2, b2 = lin(ks[2], ks[3], hidden_dim, hidden_dim)
    w3, b3 = lin(ks[4], ks[5], hidden_dim, input_dim)
    return (w1, b1, w2, b2, w3, b3)


# ------------------------------ pure-JAX reference ---------------------------
def reference_forward(y0, t, params_f, params_g):
    B, _, D = y0.shape
    y = y0.reshape(B, D).astype(jnp.float32)
    dt = t[1] - t[0]
    for i in range(t.shape[0] - 1):
        f = _mlp(y, *params_f)
        g = _mlp(y, *params_g)
        y = y + (f + g * jnp.sin(t[i])) * dt
    return y.reshape(B, 1, D)


# ---------------------------------- main --------------------------------------
if __name__ == "__main__":
    key = jax.random.PRNGKey(0)
    k_y0, k_f, k_g = jax.random.split(key, 3)

    y0 = jax.random.normal(k_y0, (BATCH, 1, INPUT_DIM), jnp.float32)
    t = jnp.linspace(0.0, 1.0, T_POINTS, dtype=jnp.float32)

    params_f = init_odefunc_params(k_f, INPUT_DIM, HIDDEN_DIM)
    params_g = init_odefunc_params(k_g, INPUT_DIM, HIDDEN_DIM)

    out = cneural_ode_forward(y0, t, params_f, params_g)
    out = jax.block_until_ready(out)

    ref = reference_forward(y0, t, params_f, params_g)
    assert out.shape == (BATCH, 1, INPUT_DIM)
    assert jnp.allclose(out, ref, rtol=1e-3, atol=1e-4), "mismatch vs reference"

    print("KERNEL_OK")
</pallas_src>

<mosaic_0001>
module attributes {stable_mosaic.version = 11 : i64} {
  func.func @cneural_ode_kernel(%arg0: memref<8xf32, #tpu.memory_space<smem>>, %arg1: memref<8x3xf32, #tpu.memory_space<vmem>>, %arg2: memref<3x64xf32, #tpu.memory_space<vmem>>, %arg3: memref<64x64xf32, #tpu.memory_space<vmem>>, %arg4: memref<64x6xf32, #tpu.memory_space<vmem>>, %arg5: memref<3x64xf32, #tpu.memory_space<vmem>>, %arg6: memref<8x3xf32, #tpu.memory_space<vmem>>) attributes {dimension_semantics = [], scalar_prefetch = 0 : i64, scratch_operands = 0 : i64, tpu.core_type = #tpu.core_type<tc>} {
    %c0 = arith.constant 0 : index
    %c0_0 = arith.constant 0 : index
    %0 = vector.load %arg2[%c0, %c0_0] : memref<3x64xf32, #tpu.memory_space<vmem>>, vector<3x64xf32>
    %c0_1 = arith.constant 0 : index
    %c0_2 = arith.constant 0 : index
    %1 = vector.load %arg3[%c0_1, %c0_2] : memref<64x64xf32, #tpu.memory_space<vmem>>, vector<64x64xf32>
    %c0_3 = arith.constant 0 : index
    %c0_4 = arith.constant 0 : index
    %2 = vector.load %arg4[%c0_3, %c0_4] : memref<64x6xf32, #tpu.memory_space<vmem>>, vector<64x6xf32>
    %c0_5 = arith.constant 0 : index
    %c0_6 = arith.constant 0 : index
    %3 = vector.load %arg5[%c0_5, %c0_6] : memref<3x64xf32, #tpu.memory_space<vmem>>, vector<3x64xf32>
    %4 = vector.extract_strided_slice %3 {offsets = [0, 0], sizes = [1, 64], strides = [1, 1]} : vector<3x64xf32> to vector<1x64xf32>
    %5 = vector.shape_cast %4 : vector<1x64xf32> to vector<1x64xf32>
    %6 = vector.broadcast %5 : vector<1x64xf32> to vector<8x64xf32>
    %7 = vector.extract_strided_slice %3 {offsets = [1, 0], sizes = [1, 64], strides = [1, 1]} : vector<3x64xf32> to vector<1x64xf32>
    %8 = vector.shape_cast %7 : vector<1x64xf32> to vector<1x64xf32>
    %9 = vector.broadcast %8 : vector<1x64xf32> to vector<8x64xf32>
    %10 = vector.extract_strided_slice %3 {offsets = [2, 0], sizes = [1, 6], strides = [1, 1]} : vector<3x64xf32> to vector<1x6xf32>
    %11 = vector.shape_cast %10 : vector<1x6xf32> to vector<1x6xf32>
    %12 = vector.broadcast %11 : vector<1x6xf32> to vector<8x6xf32>
    %c0_7 = arith.constant 0 : index
    %13 = memref.load %arg0[%c0_7] : memref<8xf32, #tpu.memory_space<smem>>
    %c0_8 = arith.constant 0 : index
    %c0_9 = arith.constant 0 : index
    %14 = vector.load %arg1[%c0_8, %c0_9] : memref<8x3xf32, #tpu.memory_space<vmem>>, vector<8x3xf32>
    %c0_i32 = arith.constant 0 : i32
    %c1_i32 = arith.constant 1 : i32
    %15 = arith.addi %c0_i32, %c1_i32 : i32
    %16 = arith.index_cast %15 : i32 to index
    %17 = memref.load %arg0[%16] : memref<8xf32, #tpu.memory_space<smem>>
    %cst = arith.constant dense<0.000000e+00> : vector<8x64xf32>
    %18 = tpu.matmul %14, %0, %cst {dimension_numbers = #tpu.dot_dimension_numbers<[1], [0], [0], [1], [0, 0, 1, 1], [], []>} : vector<8x3xf32>, vector<3x64xf32>, vector<8x64xf32> -> vector<8x64xf32>
    %19 = arith.addf %18, %6 : vector<8x64xf32>
    %20 = math.tanh %19 : vector<8x64xf32>
    %cst_10 = arith.constant dense<0.000000e+00> : vector<8x64xf32>
    %21 = tpu.matmul %20, %1, %cst_10 {dimension_numbers = #tpu.dot_dimension_numbers<[1], [0], [0], [1], [0, 0, 1, 1], [], []>} : vector<8x64xf32>, vector<64x64xf32>, vector<8x64xf32> -> vector<8x64xf32>
    %22 = arith.addf %21, %9 : vector<8x64xf32>
    %23 = math.absf %22 : vector<8x64xf32>
    %cst_11 = arith.constant 0.000000e+00 : f32
    %24 = vector.broadcast %cst_11 : f32 to vector<8x64xf32>
    %25 = arith.subf %24, %23 : vector<8x64xf32>
    %26 = math.exp %25 : vector<8x64xf32>
    %27 = math.log1p %26 : vector<8x64xf32>
    %cst_12 = arith.constant 0.000000e+00 : f32
    %28 = vector.broadcast %cst_12 : f32 to vector<8x64xf32>
    %29 = arith.maximumf %22, %28 : vector<8x64xf32>
    %30 = arith.addf %27, %29 : vector<8x64xf32>
    %cst_13 = arith.constant dense<0.000000e+00> : vector<8x6xf32>
    %31 = tpu.matmul %30, %2, %cst_13 {dimension_numbers = #tpu.dot_dimension_numbers<[1], [0], [0], [1], [0, 0, 1, 1], [], []>} : vector<8x64xf32>, vector<64x6xf32>, vector<8x6xf32> -> vector<8x6xf32>
    %32 = arith.addf %31, %12 : vector<8x6xf32>
    %33 = vector.extract_strided_slice %32 {offsets = [0, 0], sizes = [8, 3], strides = [1, 1]} : vector<8x6xf32> to vector<8x3xf32>
    %34 = vector.extract_strided_slice %32 {offsets = [0, 3], sizes = [8, 3], strides = [1, 1]} : vector<8x6xf32> to vector<8x3xf32>
    %35 = vector.broadcast %13 : f32 to vector<8x3xf32>
    %36 = arith.mulf %33, %35 : vector<8x3xf32>
    %37 = arith.addf %14, %36 : vector<8x3xf32>
    %38 = vector.broadcast %17 : f32 to vector<8x3xf32>
    %39 = arith.mulf %34, %38 : vector<8x3xf32>
    %40 = arith.addf %37, %39 : vector<8x3xf32>
    %c1_i32_14 = arith.constant 1 : i32
    %c1_i32_15 = arith.constant 1 : i32
    %41 = arith.addi %c1_i32_14, %c1_i32_15 : i32
    %42 = arith.index_cast %41 : i32 to index
    %43 = memref.load %arg0[%42] : memref<8xf32, #tpu.memory_space<smem>>
    %cst_16 = arith.constant dense<0.000000e+00> : vector<8x64xf32>
    %44 = tpu.matmul %40, %0, %cst_16 {dimension_numbers = #tpu.dot_dimension_numbers<[1], [0], [0], [1], [0, 0, 1, 1], [], []>} : vector<8x3xf32>, vector<3x64xf32>, vector<8x64xf32> -> vector<8x64xf32>
    %45 = arith.addf %44, %6 : vector<8x64xf32>
    %46 = math.tanh %45 : vector<8x64xf32>
    %cst_17 = arith.constant dense<0.000000e+00> : vector<8x64xf32>
    %47 = tpu.matmul %46, %1, %cst_17 {dimension_numbers = #tpu.dot_dimension_numbers<[1], [0], [0], [1], [0, 0, 1, 1], [], []>} : vector<8x64xf32>, vector<64x64xf32>, vector<8x64xf32> -> vector<8x64xf32>
    %48 = arith.addf %47, %9 : vector<8x64xf32>
    %49 = math.absf %48 : vector<8x64xf32>
    %cst_18 = arith.constant 0.000000e+00 : f32
    %50 = vector.broadcast %cst_18 : f32 to vector<8x64xf32>
    %51 = arith.subf %50, %49 : vector<8x64xf32>
    %52 = math.exp %51 : vector<8x64xf32>
    %53 = math.log1p %52 : vector<8x64xf32>
    %cst_19 = arith.constant 0.000000e+00 : f32
    %54 = vector.broadcast %cst_19 : f32 to vector<8x64xf32>
    %55 = arith.maximumf %48, %54 : vector<8x64xf32>
    %56 = arith.addf %53, %55 : vector<8x64xf32>
    %cst_20 = arith.constant dense<0.000000e+00> : vector<8x6xf32>
    %57 = tpu.matmul %56, %2, %cst_20 {dimension_numbers = #tpu.dot_dimension_numbers<[1], [0], [0], [1], [0, 0, 1, 1], [], []>} : vector<8x64xf32>, vector<64x6xf32>, vector<8x6xf32> -> vector<8x6xf32>
    %58 = arith.addf %57, %12 : vector<8x6xf32>
    %59 = vector.extract_strided_slice %58 {offsets = [0, 0], sizes = [8, 3], strides = [1, 1]} : vector<8x6xf32> to vector<8x3xf32>
    %60 = vector.extract_strided_slice %58 {offsets = [0, 3], sizes = [8, 3], strides = [1, 1]} : vector<8x6xf32> to vector<8x3xf32>
    %61 = vector.broadcast %13 : f32 to vector<8x3xf32>
    %62 = arith.mulf %59, %61 : vector<8x3xf32>
    %63 = arith.addf %40, %62 : vector<8x3xf32>
    %64 = vector.broadcast %43 : f32 to vector<8x3xf32>
    %65 = arith.mulf %60, %64 : vector<8x3xf32>
    %66 = arith.addf %63, %65 : vector<8x3xf32>
    %c2_i32 = arith.constant 2 : i32
    %c1_i32_21 = arith.constant 1 : i32
    %67 = arith.addi %c2_i32, %c1_i32_21 : i32
    %68 = arith.index_cast %67 : i32 to index
    %69 = memref.load %arg0[%68] : memref<8xf32, #tpu.memory_space<smem>>
    %cst_22 = arith.constant dense<0.000000e+00> : vector<8x64xf32>
    %70 = tpu.matmul %66, %0, %cst_22 {dimension_numbers = #tpu.dot_dimension_numbers<[1], [0], [0], [1], [0, 0, 1, 1], [], []>} : vector<8x3xf32>, vector<3x64xf32>, vector<8x64xf32> -> vector<8x64xf32>
    %71 = arith.addf %70, %6 : vector<8x64xf32>
    %72 = math.tanh %71 : vector<8x64xf32>
    %cst_23 = arith.constant dense<0.000000e+00> : vector<8x64xf32>
    %73 = tpu.matmul %72, %1, %cst_23 {dimension_numbers = #tpu.dot_dimension_numbers<[1], [0], [0], [1], [0, 0, 1, 1], [], []>} : vector<8x64xf32>, vector<64x64xf32>, vector<8x64xf32> -> vector<8x64xf32>
    %74 = arith.addf %73, %9 : vector<8x64xf32>
    %75 = math.absf %74 : vector<8x64xf32>
    %cst_24 = arith.constant 0.000000e+00 : f32
    %76 = vector.broadcast %cst_24 : f32 to vector<8x64xf32>
    %77 = arith.subf %76, %75 : vector<8x64xf32>
    %78 = math.exp %77 : vector<8x64xf32>
    %79 = math.log1p %78 : vector<8x64xf32>
    %cst_25 = arith.constant 0.000000e+00 : f32
    %80 = vector.broadcast %cst_25 : f32 to vector<8x64xf32>
    %81 = arith.maximumf %74, %80 : vector<8x64xf32>
    %82 = arith.addf %79, %81 : vector<8x64xf32>
    %cst_26 = arith.constant dense<0.000000e+00> : vector<8x6xf32>
    %83 = tpu.matmul %82, %2, %cst_26 {dimension_numbers = #tpu.dot_dimension_numbers<[1], [0], [0], [1], [0, 0, 1, 1], [], []>} : vector<8x64xf32>, vector<64x6xf32>, vector<8x6xf32> -> vector<8x6xf32>
    %84 = arith.addf %83, %12 : vector<8x6xf32>
    %85 = vector.extract_strided_slice %84 {offsets = [0, 0], sizes = [8, 3], strides = [1, 1]} : vector<8x6xf32> to vector<8x3xf32>
    %86 = vector.extract_strided_slice %84 {offsets = [0, 3], sizes = [8, 3], strides = [1, 1]} : vector<8x6xf32> to vector<8x3xf32>
    %87 = vector.broadcast %13 : f32 to vector<8x3xf32>
    %88 = arith.mulf %85, %87 : vector<8x3xf32>
    %89 = arith.addf %66, %88 : vector<8x3xf32>
    %90 = vector.broadcast %69 : f32 to vector<8x3xf32>
    %91 = arith.mulf %86, %90 : vector<8x3xf32>
    %92 = arith.addf %89, %91 : vector<8x3xf32>
    %c3_i32 = arith.constant 3 : i32
    %c1_i32_27 = arith.constant 1 : i32
    %93 = arith.addi %c3_i32, %c1_i32_27 : i32
    %94 = arith.index_cast %93 : i32 to index
    %95 = memref.load %arg0[%94] : memref<8xf32, #tpu.memory_space<smem>>
    %cst_28 = arith.constant dense<0.000000e+00> : vector<8x64xf32>
    %96 = tpu.matmul %92, %0, %cst_28 {dimension_numbers = #tpu.dot_dimension_numbers<[1], [0], [0], [1], [0, 0, 1, 1], [], []>} : vector<8x3xf32>, vector<3x64xf32>, vector<8x64xf32> -> vector<8x64xf32>
    %97 = arith.addf %96, %6 : vector<8x64xf32>
    %98 = math.tanh %97 : vector<8x64xf32>
    %cst_29 = arith.constant dense<0.000000e+00> : vector<8x64xf32>
    %99 = tpu.matmul %98, %1, %cst_29 {dimension_numbers = #tpu.dot_dimension_numbers<[1], [0], [0], [1], [0, 0, 1, 1], [], []>} : vector<8x64xf32>, vector<64x64xf32>, vector<8x64xf32> -> vector<8x64xf32>
    %100 = arith.addf %99, %9 : vector<8x64xf32>
    %101 = math.absf %100 : vector<8x64xf32>
    %cst_30 = arith.constant 0.000000e+00 : f32
    %102 = vector.broadcast %cst_30 : f32 to vector<8x64xf32>
    %103 = arith.subf %102, %101 : vector<8x64xf32>
    %104 = math.exp %103 : vector<8x64xf32>
    %105 = math.log1p %104 : vector<8x64xf32>
    %cst_31 = arith.constant 0.000000e+00 : f32
    %106 = vector.broadcast %cst_31 : f32 to vector<8x64xf32>
    %107 = arith.maximumf %100, %106 : vector<8x64xf32>
    %108 = arith.addf %105, %107 : vector<8x64xf32>
    %cst_32 = arith.constant dense<0.000000e+00> : vector<8x6xf32>
    %109 = tpu.matmul %108, %2, %cst_32 {dimension_numbers = #tpu.dot_dimension_numbers<[1], [0], [0], [1], [0, 0, 1, 1], [], []>} : vector<8x64xf32>, vector<64x6xf32>, vector<8x6xf32> -> vector<8x6xf32>
    %110 = arith.addf %109, %12 : vector<8x6xf32>
    %111 = vector.extract_strided_slice %110 {offsets = [0, 0], sizes = [8, 3], strides = [1, 1]} : vector<8x6xf32> to vector<8x3xf32>
    %112 = vector.extract_strided_slice %110 {offsets = [0, 3], sizes = [8, 3], strides = [1, 1]} : vector<8x6xf32> to vector<8x3xf32>
    %113 = vector.broadcast %13 : f32 to vector<8x3xf32>
    %114 = arith.mulf %111, %113 : vector<8x3xf32>
    %115 = arith.addf %92, %114 : vector<8x3xf32>
    %116 = vector.broadcast %95 : f32 to vector<8x3xf32>
    %117 = arith.mulf %112, %116 : vector<8x3xf32>
    %118 = arith.addf %115, %117 : vector<8x3xf32>
    %c4_i32 = arith.constant 4 : i32
    %c1_i32_33 = arith.constant 1 : i32
    %119 = arith.addi %c4_i32, %c1_i32_33 : i32
    %120 = arith.index_cast %119 : i32 to index
    %121 = memref.load %arg0[%120] : memref<8xf32, #tpu.memory_space<smem>>
    %cst_34 = arith.constant dense<0.000000e+00> : vector<8x64xf32>
    %122 = tpu.matmul %118, %0, %cst_34 {dimension_numbers = #tpu.dot_dimension_numbers<[1], [0], [0], [1], [0, 0, 1, 1], [], []>} : vector<8x3xf32>, vector<3x64xf32>, vector<8x64xf32> -> vector<8x64xf32>
    %123 = arith.addf %122, %6 : vector<8x64xf32>
    %124 = math.tanh %123 : vector<8x64xf32>
    %cst_35 = arith.constant dense<0.000000e+00> : vector<8x64xf32>
    %125 = tpu.matmul %124, %1, %cst_35 {dimension_numbers = #tpu.dot_dimension_numbers<[1], [0], [0], [1], [0, 0, 1, 1], [], []>} : vector<8x64xf32>, vector<64x64xf32>, vector<8x64xf32> -> vector<8x64xf32>
    %126 = arith.addf %125, %9 : vector<8x64xf32>
    %127 = math.absf %126 : vector<8x64xf32>
    %cst_36 = arith.constant 0.000000e+00 : f32
    %128 = vector.broadcast %cst_36 : f32 to vector<8x64xf32>
    %129 = arith.subf %128, %127 : vector<8x64xf32>
    %130 = math.exp %129 : vector<8x64xf32>
    %131 = math.log1p %130 : vector<8x64xf32>
    %cst_37 = arith.constant 0.000000e+00 : f32
    %132 = vector.broadcast %cst_37 : f32 to vector<8x64xf32>
    %133 = arith.maximumf %126, %132 : vector<8x64xf32>
    %134 = arith.addf %131, %133 : vector<8x64xf32>
    %cst_38 = arith.constant dense<0.000000e+00> : vector<8x6xf32>
    %135 = tpu.matmul %134, %2, %cst_38 {dimension_numbers = #tpu.dot_dimension_numbers<[1], [0], [0], [1], [0, 0, 1, 1], [], []>} : vector<8x64xf32>, vector<64x6xf32>, vector<8x6xf32> -> vector<8x6xf32>
    %136 = arith.addf %135, %12 : vector<8x6xf32>
    %137 = vector.extract_strided_slice %136 {offsets = [0, 0], sizes = [8, 3], strides = [1, 1]} : vector<8x6xf32> to vector<8x3xf32>
    %138 = vector.extract_strided_slice %136 {offsets = [0, 3], sizes = [8, 3], strides = [1, 1]} : vector<8x6xf32> to vector<8x3xf32>
    %139 = vector.broadcast %13 : f32 to vector<8x3xf32>
    %140 = arith.mulf %137, %139 : vector<8x3xf32>
    %141 = arith.addf %118, %140 : vector<8x3xf32>
    %142 = vector.broadcast %121 : f32 to vector<8x3xf32>
    %143 = arith.mulf %138, %142 : vector<8x3xf32>
    %144 = arith.addf %141, %143 : vector<8x3xf32>
    %c5_i32 = arith.constant 5 : i32
    %c1_i32_39 = arith.constant 1 : i32
    %145 = arith.addi %c5_i32, %c1_i32_39 : i32
    %146 = arith.index_cast %145 : i32 to index
    %147 = memref.load %arg0[%146] : memref<8xf32, #tpu.memory_space<smem>>
    %cst_40 = arith.constant dense<0.000000e+00> : vector<8x64xf32>
    %148 = tpu.matmul %144, %0, %cst_40 {dimension_numbers = #tpu.dot_dimension_numbers<[1], [0], [0], [1], [0, 0, 1, 1], [], []>} : vector<8x3xf32>, vector<3x64xf32>, vector<8x64xf32> -> vector<8x64xf32>
    %149 = arith.addf %148, %6 : vector<8x64xf32>
    %150 = math.tanh %149 : vector<8x64xf32>
    %cst_41 = arith.constant dense<0.000000e+00> : vector<8x64xf32>
    %151 = tpu.matmul %150, %1, %cst_41 {dimension_numbers = #tpu.dot_dimension_numbers<[1], [0], [0], [1], [0, 0, 1, 1], [], []>} : vector<8x64xf32>, vector<64x64xf32>, vector<8x64xf32> -> vector<8x64xf32>
    %152 = arith.addf %151, %9 : vector<8x64xf32>
    %153 = math.absf %152 : vector<8x64xf32>
    %cst_42 = arith.constant 0.000000e+00 : f32
    %154 = vector.broadcast %cst_42 : f32 to vector<8x64xf32>
    %155 = arith.subf %154, %153 : vector<8x64xf32>
    %156 = math.exp %155 : vector<8x64xf32>
    %157 = math.log1p %156 : vector<8x64xf32>
    %cst_43 = arith.constant 0.000000e+00 : f32
    %158 = vector.broadcast %cst_43 : f32 to vector<8x64xf32>
    %159 = arith.maximumf %152, %158 : vector<8x64xf32>
    %160 = arith.addf %157, %159 : vector<8x64xf32>
    %cst_44 = arith.constant dense<0.000000e+00> : vector<8x6xf32>
    %161 = tpu.matmul %160, %2, %cst_44 {dimension_numbers = #tpu.dot_dimension_numbers<[1], [0], [0], [1], [0, 0, 1, 1], [], []>} : vector<8x64xf32>, vector<64x6xf32>, vector<8x6xf32> -> vector<8x6xf32>
    %162 = arith.addf %161, %12 : vector<8x6xf32>
    %163 = vector.extract_strided_slice %162 {offsets = [0, 0], sizes = [8, 3], strides = [1, 1]} : vector<8x6xf32> to vector<8x3xf32>
    %164 = vector.extract_strided_slice %162 {offsets = [0, 3], sizes = [8, 3], strides = [1, 1]} : vector<8x6xf32> to vector<8x3xf32>
    %165 = vector.broadcast %13 : f32 to vector<8x3xf32>
    %166 = arith.mulf %163, %165 : vector<8x3xf32>
    %167 = arith.addf %144, %166 : vector<8x3xf32>
    %168 = vector.broadcast %147 : f32 to vector<8x3xf32>
    %169 = arith.mulf %164, %168 : vector<8x3xf32>
    %170 = arith.addf %167, %169 : vector<8x3xf32>
    %c6_i32 = arith.constant 6 : i32
    %c1_i32_45 = arith.constant 1 : i32
    %171 = arith.addi %c6_i32, %c1_i32_45 : i32
    %172 = arith.index_cast %171 : i32 to index
    %173 = memref.load %arg0[%172] : memref<8xf32, #tpu.memory_space<smem>>
    %cst_46 = arith.constant dense<0.000000e+00> : vector<8x64xf32>
    %174 = tpu.matmul %170, %0, %cst_46 {dimension_numbers = #tpu.dot_dimension_numbers<[1], [0], [0], [1], [0, 0, 1, 1], [], []>} : vector<8x3xf32>, vector<3x64xf32>, vector<8x64xf32> -> vector<8x64xf32>
    %175 = arith.addf %174, %6 : vector<8x64xf32>
    %176 = math.tanh %175 : vector<8x64xf32>
    %cst_47 = arith.constant dense<0.000000e+00> : vector<8x64xf32>
    %177 = tpu.matmul %176, %1, %cst_47 {dimension_numbers = #tpu.dot_dimension_numbers<[1], [0], [0], [1], [0, 0, 1, 1], [], []>} : vector<8x64xf32>, vector<64x64xf32>, vector<8x64xf32> -> vector<8x64xf32>
    %178 = arith.addf %177, %9 : vector<8x64xf32>
    %179 = math.absf %178 : vector<8x64xf32>
    %cst_48 = arith.constant 0.000000e+00 : f32
    %180 = vector.broadcast %cst_48 : f32 to vector<8x64xf32>
    %181 = arith.subf %180, %179 : vector<8x64xf32>
    %182 = math.exp %181 : vector<8x64xf32>
    %183 = math.log1p %182 : vector<8x64xf32>
    %cst_49 = arith.constant 0.000000e+00 : f32
    %184 = vector.broadcast %cst_49 : f32 to vector<8x64xf32>
    %185 = arith.maximumf %178, %184 : vector<8x64xf32>
    %186 = arith.addf %183, %185 : vector<8x64xf32>
    %cst_50 = arith.constant dense<0.000000e+00> : vector<8x6xf32>
    %187 = tpu.matmul %186, %2, %cst_50 {dimension_numbers = #tpu.dot_dimension_numbers<[1], [0], [0], [1], [0, 0, 1, 1], [], []>} : vector<8x64xf32>, vector<64x6xf32>, vector<8x6xf32> -> vector<8x6xf32>
    %188 = arith.addf %187, %12 : vector<8x6xf32>
    %189 = vector.extract_strided_slice %188 {offsets = [0, 0], sizes = [8, 3], strides = [1, 1]} : vector<8x6xf32> to vector<8x3xf32>
    %190 = vector.extract_strided_slice %188 {offsets = [0, 3], sizes = [8, 3], strides = [1, 1]} : vector<8x6xf32> to vector<8x3xf32>
    %191 = vector.broadcast %13 : f32 to vector<8x3xf32>
    %192 = arith.mulf %189, %191 : vector<8x3xf32>
    %193 = arith.addf %170, %192 : vector<8x3xf32>
    %194 = vector.broadcast %173 : f32 to vector<8x3xf32>
    %195 = arith.mulf %190, %194 : vector<8x3xf32>
    %196 = arith.addf %193, %195 : vector<8x3xf32>
    %c7_i32 = arith.constant 7 : i32
    %c0_51 = arith.constant 0 : index
    %c0_52 = arith.constant 0 : index
    %197 = vector.load %arg6[%c0_51, %c0_52] : memref<8x3xf32, #tpu.memory_space<vmem>>, vector<8x3xf32>
    tpu.vector_store %arg6[%c0_51, %c0_52], %196 {strides = array<i32>} : memref<8x3xf32, #tpu.memory_space<vmem>>, vector<8x3xf32>,
    return
  }
}

</mosaic_0001>

<bundles_post_ra>
// kernel: cneural_ode_forward.1
= control target key start
LH: loop header
LB: loop body
LE: loop exit
PB: predicated region body
PF: predicated region fallthrough
CT: control target
= control target key end

     0   :  { %11 = vsyncpa [#allocation3], 0  ;;  %s830_s24 = smov [#allocation2]   ;;  %s1164_s0 = inlined_call_operand.vmem [shape: f32[8], index: 0, kind: input, shape index: {}]   ;;  %s1165_s1 = inlined_call_operand.vmem [shape: f32[8,3], index: 1, kind: input, shape index: {}]   ;;  %s1166_s2 = inlined_call_operand.vmem [shape: f32[3,64], index: 2, kind: input, shape index: {}]   ;;  %s1167_s3 = inlined_call_operand.vmem [shape: f32[64,64], index: 3, kind: input, shape index: {}]   ;;  %s1168_s4 = inlined_call_operand.vmem [shape: f32[64,6], index: 4, kind: input, shape index: {}]   ;;  %s1169_s5 = inlined_call_operand.vmem [shape: f32[3,64], index: 5, kind: input, shape index: {}]   ;;  %s1170_s6 = inlined_call_operand.vmem [shape: f32[8,3], index: 6, kind: output, shape index: {}]  }
   0x1   :  { %s17_s23 = sshll.u32 %s1164_s0, 4  ;;  %s18_s23 = int_to_ptr.vmem [resolvable:$true] %s17_s23 }
   0x2   :  { %20 = dma.vmem_to_smem %s18_s23, 16, %s830_s24, [#allocation3]  }
   0x3   :  { %828 = dma.done.wait [#allocation3], 16  }
   0x4   :  { %829 = vsyncadd [#allocation3], 4294967280 }
   0x5   :  { %35 = sfence }
   0x6   :  { %v873_v0 = vld [vmem:[%s1166_s2] sm:$0x7]  ;;  %vm64_vm0 = vcmask 1042432   ;;  %vm60_vm1 = vcmask 23552   ;;  %v883_v2 = vld [vmem:[%s1167_s3 + $0x38] sm:$0xff]  ;;  %v891_v3 = vld [vmem:[%s1167_s3 + $0x30] sm:$0xff] }
   0x7   :  { %v878_v1 = vld [vmem:[%s1165_s1] sm:$0xff]  ;;  %738 = vmatpush.msk.msra.mxu0 %vm64_vm0, %v873_v0  ;;  %101 = vmatpush.msra.mxu1 %v883_v2  ;;  %v898_v4 = vld [vmem:[%s1167_s3 + $0x28] sm:$0xff]  ;;  %v917_v6 = vld [vmem:[%s1167_s3 + $0x18] sm:$0xff]  ;;  %vm89_vm2 = vcmask 523264   ;;  %s831_s7 = smov 125   ;;  %s57_s8 = sld [smem:[#allocation2]] }
   0x8   :  { %739 = vmatmul.msk.f32.vlgmr.msra.gmra.mxu0 %vm60_vm1, %v878_v1  ;;  %743 = vmatpush.msk.msra.mxu3 %vm64_vm0, %v873_v0  ;;  %v910_v5 = vld [vmem:[%s1167_s3 + $0x20] sm:$0xff]  ;;  %v923_v7 = vld [vmem:[%s1167_s3 + $0x10] sm:$0xff]  ;;  %v929_v8 = vld [vmem:[%s1167_s3 + $0x8] sm:$0xff]  ;;  %s742_s9 = sld [smem:[#allocation2 + $0x2]] }
   0x9   :  { %102 = vmatpush.msra.mxu1 %v891_v3  ;;  %197 = vmatpush.msrb.mxu0 %v883_v2  ;;  %v936_v9 = vld [vmem:[%s1167_s3] sm:$0xff]  ;;  %v965_v15 = vld [vmem:[%s1168_s4 + $0x38] sm:$0xff]  ;;  %v970_v16 = vld [vmem:[%s1168_s4 + $0x30] sm:$0xff]  ;;  %s747_s10 = sld [smem:[#allocation2 + $0x3]] }
   0xa   :  { %v947_v10 = vld [vmem:[%s1169_s5] sm:$0x7]  ;;  %139 = vmatpush.msra.mxu2 %v965_v15  ;;  %235 = vmatpush.msrb.mxu3 %v965_v15  ;;  %v977_v17 = vld [vmem:[%s1168_s4 + $0x28] sm:$0xff]  ;;  %v993_v19 = vld [vmem:[%s1168_s4 + $0x18] sm:$0xff]  ;;  %s752_s11 = sld [smem:[#allocation2 + $0x4]] }
   0xb   :  { %103 = vmatpush.msra.mxu1 %v898_v4  ;;  %198 = vmatpush.msrb.mxu0 %v891_v3  ;;  %v950_v11 = vperm.slane %v947_v10, 0  ;;  %v985_v18 = vld [vmem:[%s1168_s4 + $0x20] sm:$0xff]  ;;  %v1001_v20 = vld [vmem:[%s1168_s4 + $0x10] sm:$0xff]  ;;  %v1009_v21 = vld [vmem:[%s1168_s4 + $0x8] sm:$0xff]  ;;  %v1029_v23 = vperm.slane %v947_v10, 1  ;;  %v1042_v40 = vperm.slane %v947_v10, 2 }
   0xc   :  { %140 = vmatpush.msra.mxu2 %v970_v16  ;;  %236 = vmatpush.msrb.mxu3 %v970_v16  ;;  %v1017_v22 = vld [vmem:[%s1168_s4] sm:$0xff]  ;;  %s737_s4 = sld [smem:[#allocation2 + $0x1]] }
   0xd   :  { %199 = vmatpush.msrb.mxu0 %v898_v4  ;;  %104 = vmatpush.msra.mxu1 %v910_v5  ;;  %v1046_v45 = vstv %s57_s8  ;;  %s757_s12 = sld [smem:[#allocation2 + $0x5]] }
   0xe   :  { %141 = vmatpush.msra.mxu2 %v977_v17  ;;  %237 = vmatpush.msrb.mxu3 %v977_v17  ;;  %s762_s13 = sld [smem:[#allocation2 + $0x6]] }
   0xf   :  { %200 = vmatpush.msrb.mxu0 %v910_v5  ;;  %105 = vmatpush.msra.mxu1 %v917_v6  ;;  %s767_s14 = sld [smem:[#allocation2 + $0x7]] }
  0x10   :  { %142 = vmatpush.msra.mxu2 %v985_v18  ;;  %238 = vmatpush.msrb.mxu3 %v985_v18 }
  0x11   :  { %201 = vmatpush.msrb.mxu0 %v917_v6  ;;  %106 = vmatpush.msra.mxu1 %v923_v7 }
  0x12   :  { %143 = vmatpush.msra.mxu2 %v993_v19  ;;  %239 = vmatpush.msrb.mxu3 %v993_v19  ;;  %v154_v42 = vstv %s737_s4 }
  0x13   :  { %202 = vmatpush.msrb.mxu0 %v923_v7  ;;  %107 = vmatpush.msra.mxu1 %v929_v8 }
  0x14   :  { %144 = vmatpush.msra.mxu2 %v1001_v20  ;;  %240 = vmatpush.msrb.mxu3 %v1001_v20 }
  0x15   :  { %203 = vmatpush.msrb.mxu0 %v929_v8  ;;  %108 = vmatpush.msra.mxu1 %v936_v9 }
  0x16   :  { %145 = vmatpush.msra.mxu2 %v1009_v21  ;;  %241 = vmatpush.msrb.mxu3 %v1009_v21 }
  0x17   :  { %204 = vmatpush.msrb.mxu0 %v936_v9  ;;  %748 = vmatpush.msk.msrb.mxu1 %vm64_vm0, %v873_v0 }
  0x18   :  { %146 = vmatpush.msra.mxu2 %v1017_v22  ;;  %242 = vmatpush.msrb.mxu3 %v1017_v22 }
  0x19   :  { %330 = vmatpush.msra.mxu0 %v965_v15 }
  0x1a   :  { %292 = vmatpush.msrb.mxu2 %v883_v2 }
  0x1b   :  { %331 = vmatpush.msra.mxu0 %v970_v16 }
  0x1c   :  { %293 = vmatpush.msrb.mxu2 %v891_v3 }
  0x1d   :  { %332 = vmatpush.msra.mxu0 %v977_v17 }
  0x1e   :  { %294 = vmatpush.msrb.mxu2 %v898_v4 }
  0x1f   :  { %333 = vmatpush.msra.mxu0 %v985_v18 }
  0x20   :  { %295 = vmatpush.msrb.mxu2 %v910_v5 }
  0x21   :  { %334 = vmatpush.msra.mxu0 %v993_v19 }
  0x22   :  { %296 = vmatpush.msrb.mxu2 %v917_v6 }
  0x23   :  { %335 = vmatpush.msra.mxu0 %v1001_v20 }
  0x24   :  { %297 = vmatpush.msrb.mxu2 %v923_v7 }
  0x25   :  { %336 = vmatpush.msra.mxu0 %v1009_v21 }
  0x26   :  { %298 = vmatpush.msrb.mxu2 %v929_v8 }
  0x27   :  { %337 = vmatpush.msra.mxu0 %v1017_v22 }
  0x28   :  { %299 = vmatpush.msrb.mxu2 %v936_v9 }
  0x85   :  { %v85_v12 = vpop.f32.mrf.mxu0 }
  0x86   :  { %v86_v13 = vadd.f32 %v85_v12, %v950_v11 }
  0x88   :  { %774 = vtanh.f32 %v86_v13 }
  0x8e   :  { %v775_v14 = vpop.eup %774 }
  0x8f   :  { %740 = vmatmul.msk.f32.vlgmr.msra.gmra.mxu1 %vm89_vm2, %v775_v14 }
  0x90   :  { %387 = vmatpush.msra.mxu1 %v883_v2 }
  0x92   :  { %388 = vmatpush.msra.mxu1 %v891_v3 }
  0x94   :  { %389 = vmatpush.msra.mxu1 %v898_v4 }
  0x96   :  { %390 = vmatpush.msra.mxu1 %v910_v5 }
  0x98   :  { %391 = vmatpush.msra.mxu1 %v917_v6 }
  0x9a   :  { %392 = vmatpush.msra.mxu1 %v923_v7 }
  0x9c   :  { %393 = vmatpush.msra.mxu1 %v929_v8 }
  0x9e   :  { %394 = vmatpush.msra.mxu1 %v936_v9 }
 0x10c   :  { %v110_v24 = vpop.f32.mrf.mxu1 }
 0x10d   :  { %v111_v25 = vadd.f32 %v110_v24, %v1029_v23 }
 0x10f   :  { %v113_v26 = vand.u32 2147483647, %v111_v25  ;;  %v126_v37 = vmax.f32 %v111_v25, 0.0  ;;  %v249_v25 = vstv %s742_s9 }
 0x111   :  { %v114_v27 = vsub.f32 0.0, %v113_v26 }
 0x113   :  { %v115_v28 = vmul.f32 1.442695, %v114_v27 }
 0x115   :  { %776 = vpow2.f32 %v115_v28 }
 0x11b   :  { %v777_v29 = vpop.eup %776 }
 0x11c   :  { %v117_v30 = vadd.f32 1.0, %v777_v29  ;;  %v120_v31 = vmul.f32 -0.5, %v777_v29  ;;  %v123_v33 = vand.u32 2147483647, %v777_v29 }
 0x11e   :  { %778 = vlog2.f32 %v117_v30  ;;  %v121_v32 = vadd.f32 1.0, %v120_v31  ;;  %vm124_vm3 = vcmp.lt.f32.partialorder %v123_v33, 0.0004427343 }
 0x120   :  { %v122_v36 = vmul.f32 %v777_v29, %v121_v32 }
 0x124   :  { %v779_v34 = vpop.eup %778 }
 0x125   :  { %v119_v35 = vmul.f32 0.6931472, %v779_v34 }
 0x127   :  { %v125_v38 = vsel %vm124_vm3, %v122_v36, %v119_v35 }
 0x128   :  { %v127_v39 = vadd.f32 %v126_v37, %v125_v38 }
 0x12a   :  { %741 = vmatmul.msk.f32.vlgmr.msra.gmra.mxu2 %vm89_vm2, %v127_v39 }
 0x12b   :  { %758 = vmatpush.msk.msra.mxu2 %vm64_vm0, %v873_v0 }
 0x1ad   :  { %v148_v41 = vpop.f32.mrf.mxu2 }
 0x1ae   :  { %v149_v43 = vadd.f32 %v148_v41, %v1042_v40 }
 0x1b0   :  { %v155_v44 = vmul.f32 %v154_v42, %v149_v43  ;;  %v152_v46 = vmul.f32 %v1046_v45, %v149_v43 }
 0x1b2   :  { %157 = vrot.lane.b32.xlu0 %v155_v44, %s831_s7  ;;  %v153_v47 = vadd.f32 %v152_v46, %v878_v1 }
 0x224   :  { %v158_v48 = vpop.permute.xlu0 %157 }
 0x225   :  { %v160_v49 = vadd.f32 %v158_v48, %v153_v47 }
 0x227   :  { %744 = vmatmul.msk.f32.vlgmr.msra.gmra.mxu3 %vm60_vm1, %v160_v49 }
 0x228   :  { %753 = vmatpush.msk.msra.mxu3 %vm64_vm0, %v873_v0 }
 0x2aa   :  { %v182_v50 = vpop.f32.mrf.mxu3 }
 0x2ab   :  { %v183_v51 = vadd.f32 %v182_v50, %v950_v11 }
 0x2ad   :  { %780 = vtanh.f32 %v183_v51 }
 0x2b3   :  { %v781_v52 = vpop.eup %780 }
 0x2b4   :  { %745 = vmatmul.msk.f32.vlgmr.msrb.gmra.mxu0 %vm89_vm2, %v781_v52 }
 0x2b5   :  { %482 = vmatpush.msrb.mxu0 %v883_v2 }
 0x2b7   :  { %483 = vmatpush.msrb.mxu0 %v891_v3 }
 0x2b9   :  { %484 = vmatpush.msrb.mxu0 %v898_v4 }
 0x2bb   :  { %485 = vmatpush.msrb.mxu0 %v910_v5 }
 0x2bd   :  { %486 = vmatpush.msrb.mxu0 %v917_v6 }
 0x2bf   :  { %487 = vmatpush.msrb.mxu0 %v923_v7 }
 0x2c1   :  { %488 = vmatpush.msrb.mxu0 %v929_v8 }
 0x2c3   :  { %489 = vmatpush.msrb.mxu0 %v936_v9 }
 0x331   :  { %v206_v53 = vpop.f32.mrf.mxu0 }
 0x332   :  { %v207_v54 = vadd.f32 %v206_v53, %v1029_v23 }
 0x334   :  { %v209_v55 = vand.u32 2147483647, %v207_v54  ;;  %v222_v12 = vmax.f32 %v207_v54, 0.0  ;;  %v344_v54 = vstv %s747_s10 }
 0x336   :  { %v210_v56 = vsub.f32 0.0, %v209_v55 }
 0x338   :  { %v211_v57 = vmul.f32 1.442695, %v210_v56 }
 0x33a   :  { %782 = vpow2.f32 %v211_v57 }
 0x340   :  { %v783_v58 = vpop.eup %782 }
 0x341   :  { %v213_v59 = vadd.f32 1.0, %v783_v58  ;;  %v216_v60 = vmul.f32 -0.5, %v783_v58  ;;  %v219_v62 = vand.u32 2147483647, %v783_v58 }
 0x343   :  { %784 = vlog2.f32 %v213_v59  ;;  %v217_v61 = vadd.f32 1.0, %v216_v60  ;;  %vm220_vm4 = vcmp.lt.f32.partialorder %v219_v62, 0.0004427343 }
 0x345   :  { %v218_v10 = vmul.f32 %v783_v58, %v217_v61 }
 0x349   :  { %v785_v63 = vpop.eup %784 }
 0x34a   :  { %v215_v1 = vmul.f32 0.6931472, %v785_v63 }
 0x34c   :  { %v221_v13 = vsel %vm220_vm4, %v218_v10, %v215_v1 }
 0x34d   :  { %v223_v14 = vadd.f32 %v222_v12, %v221_v13 }
 0x34f   :  { %746 = vmatmul.msk.f32.vlgmr.msrb.gmra.mxu3 %vm89_vm2, %v223_v14 }
 0x350   :  { %425 = vmatpush.msrb.mxu3 %v965_v15 }
 0x352   :  { %426 = vmatpush.msrb.mxu3 %v970_v16 }
 0x354   :  { %427 = vmatpush.msrb.mxu3 %v977_v17 }
 0x356   :  { %428 = vmatpush.msrb.mxu3 %v985_v18 }
 0x358   :  { %429 = vmatpush.msrb.mxu3 %v993_v19 }
 0x35a   :  { %430 = vmatpush.msrb.mxu3 %v1001_v20 }
 0x35c   :  { %431 = vmatpush.msrb.mxu3 %v1009_v21 }
 0x35e   :  { %432 = vmatpush.msrb.mxu3 %v1017_v22 }
 0x3d2   :  { %v244_v24 = vpop.f32.mrf.mxu3 }
 0x3d3   :  { %v245_v26 = vadd.f32 %v244_v24, %v1042_v40 }
 0x3d5   :  { %v250_v27 = vmul.f32 %v249_v25, %v245_v26  ;;  %v247_v28 = vmul.f32 %v245_v26, %v1046_v45 }
 0x3d7   :  { %252 = vrot.lane.b32.xlu0 %v250_v27, %s831_s7  ;;  %v248_v29 = vadd.f32 %v247_v28, %v160_v49  ;;  %v439_v28 = vstv %s752_s11 }
 0x449   :  { %v253_v30 = vpop.permute.xlu0 %252 }
 0x44a   :  { %v255_v31 = vadd.f32 %v253_v30, %v248_v29 }
 0x44c   :  { %749 = vmatmul.msk.f32.vlgmr.msrb.gmra.mxu1 %vm60_vm1, %v255_v31 }
 0x44d   :  { %520 = vmatpush.msrb.mxu1 %v965_v15 }
 0x44f   :  { %521 = vmatpush.msrb.mxu1 %v970_v16 }
 0x451   :  { %522 = vmatpush.msrb.mxu1 %v977_v17 }
 0x453   :  { %523 = vmatpush.msrb.mxu1 %v985_v18 }
 0x455   :  { %524 = vmatpush.msrb.mxu1 %v993_v19 }
 0x457   :  { %525 = vmatpush.msrb.mxu1 %v1001_v20 }
 0x459   :  { %526 = vmatpush.msrb.mxu1 %v1009_v21 }
 0x45b   :  { %527 = vmatpush.msrb.mxu1 %v1017_v22 }
 0x4c9   :  { %v277_v32 = vpop.f32.mrf.mxu1 }
 0x4ca   :  { %v278_v33 = vadd.f32 %v277_v32, %v950_v11 }
 0x4cc   :  { %786 = vtanh.f32 %v278_v33 }
 0x4d2   :  { %v787_v34 = vpop.eup %786 }
 0x4d3   :  { %750 = vmatmul.msk.f32.vlgmr.msrb.gmra.mxu2 %vm89_vm2, %v787_v34 }
 0x4d4   :  { %763 = vmatpush.msk.msrb.mxu2 %vm64_vm0, %v873_v0 }
 0x556   :  { %v301_v35 = vpop.f32.mrf.mxu2 }
 0x557   :  { %v302_v36 = vadd.f32 %v301_v35, %v1029_v23 }
 0x559   :  { %v304_v37 = vand.u32 2147483647, %v302_v36  ;;  %v317_v50 = vmax.f32 %v302_v36, 0.0 }
 0x55b   :  { %v305_v38 = vsub.f32 0.0, %v304_v37 }
 0x55d   :  { %v306_v39 = vmul.f32 1.442695, %v305_v38 }
 0x55f   :  { %788 = vpow2.f32 %v306_v39 }
 0x565   :  { %v789_v41 = vpop.eup %788 }
 0x566   :  { %v308_v42 = vadd.f32 1.0, %v789_v41  ;;  %v311_v43 = vmul.f32 -0.5, %v789_v41  ;;  %v314_v46 = vand.u32 2147483647, %v789_v41 }
 0x568   :  { %790 = vlog2.f32 %v308_v42  ;;  %v312_v44 = vadd.f32 1.0, %v311_v43  ;;  %vm315_vm5 = vcmp.lt.f32.partialorder %v314_v46, 0.0004427343 }
 0x56a   :  { %v313_v49 = vmul.f32 %v789_v41, %v312_v44 }
 0x56e   :  { %v791_v47 = vpop.eup %790 }
 0x56f   :  { %v310_v48 = vmul.f32 0.6931472, %v791_v47 }
 0x571   :  { %v316_v51 = vsel %vm315_vm5, %v313_v49, %v310_v48  ;;  %v534_v48 = vstv %s757_s12 }
 0x572   :  { %v318_v52 = vadd.f32 %v317_v50, %v316_v51 }
 0x574   :  { %751 = vmatmul.msk.f32.vlgmr.msra.gmra.mxu0 %vm89_vm2, %v318_v52 }
 0x575   :  { %710 = vmatpush.msra.mxu0 %v965_v15 }
 0x577   :  { %711 = vmatpush.msra.mxu0 %v970_v16 }
 0x579   :  { %712 = vmatpush.msra.mxu0 %v977_v17 }
 0x57b   :  { %713 = vmatpush.msra.mxu0 %v985_v18 }
 0x57d   :  { %714 = vmatpush.msra.mxu0 %v993_v19 }
 0x57f   :  { %715 = vmatpush.msra.mxu0 %v1001_v20 }
 0x581   :  { %716 = vmatpush.msra.mxu0 %v1009_v21 }
 0x583   :  { %717 = vmatpush.msra.mxu0 %v1017_v22 }
 0x5f1   :  { %v339_v53 = vpop.f32.mrf.mxu0 }
 0x5f2   :  { %v340_v55 = vadd.f32 %v339_v53, %v1042_v40 }
 0x5f4   :  { %v345_v56 = vmul.f32 %v344_v54, %v340_v55  ;;  %v342_v57 = vmul.f32 %v340_v55, %v1046_v45 }
 0x5f6   :  { %347 = vrot.lane.b32.xlu1 %v345_v56, %s831_s7  ;;  %v343_v58 = vadd.f32 %v342_v57, %v255_v31 }
 0x668   :  { %v348_v59 = vpop.permute.xlu1 %347 }
 0x669   :  { %v350_v60 = vadd.f32 %v348_v59, %v343_v58 }
 0x66b   :  { %754 = vmatmul.msk.f32.vlgmr.msra.gmra.mxu3 %vm60_vm1, %v350_v60 }
 0x66c   :  { %577 = vmatpush.msra.mxu3 %v883_v2 }
 0x66e   :  { %578 = vmatpush.msra.mxu3 %v891_v3 }
 0x670   :  { %579 = vmatpush.msra.mxu3 %v898_v4 }
 0x672   :  { %580 = vmatpush.msra.mxu3 %v910_v5 }
 0x674   :  { %581 = vmatpush.msra.mxu3 %v917_v6 }
 0x676   :  { %582 = vmatpush.msra.mxu3 %v923_v7 }
 0x678   :  { %583 = vmatpush.msra.mxu3 %v929_v8 }
 0x67a   :  { %584 = vmatpush.msra.mxu3 %v936_v9 }
 0x6ee   :  { %v372_v61 = vpop.f32.mrf.mxu3 }
 0x6ef   :  { %v373_v62 = vadd.f32 %v372_v61, %v950_v11 }
 0x6f1   :  { %792 = vtanh.f32 %v373_v62 }
 0x6f7   :  { %v793_v63 = vpop.eup %792 }
 0x6f8   :  { %755 = vmatmul.msk.f32.vlgmr.msra.gmra.mxu1 %vm89_vm2, %v793_v63 }
 0x6f9   :  { %672 = vmatpush.msra.mxu1 %v883_v2 }
 0x6fb   :  { %673 = vmatpush.msra.mxu1 %v891_v3 }
 0x6fd   :  { %674 = vmatpush.msra.mxu1 %v898_v4 }
 0x6ff   :  { %675 = vmatpush.msra.mxu1 %v910_v5 }
 0x701   :  { %676 = vmatpush.msra.mxu1 %v917_v6 }
 0x703   :  { %677 = vmatpush.msra.mxu1 %v923_v7 }
 0x705   :  { %678 = vmatpush.msra.mxu1 %v929_v8 }
 0x707   :  { %679 = vmatpush.msra.mxu1 %v936_v9 }
 0x775   :  { %v396_v1 = vpop.f32.mrf.mxu1 }
 0x776   :  { %v397_v10 = vadd.f32 %v396_v1, %v1029_v23 }
 0x778   :  { %v399_v12 = vand.u32 2147483647, %v397_v10  ;;  %v412_v8 = vmax.f32 %v397_v10, 0.0 }
 0x77a   :  { %v400_v13 = vsub.f32 0.0, %v399_v12 }
 0x77c   :  { %v401_v2 = vmul.f32 1.442695, %v400_v13 }
 0x77e   :  { %794 = vpow2.f32 %v401_v2 }
 0x784   :  { %v795_v3 = vpop.eup %794 }
 0x785   :  { %v403_v14 = vadd.f32 1.0, %v795_v3  ;;  %v406_v4 = vmul.f32 -0.5, %v795_v3  ;;  %v409_v24 = vand.u32 2147483647, %v795_v3 }
 0x787   :  { %796 = vlog2.f32 %v403_v14  ;;  %v407_v5 = vadd.f32 1.0, %v406_v4  ;;  %vm410_vm6 = vcmp.lt.f32.partialorder %v409_v24, 0.0004427343 }
 0x789   :  { %v408_v7 = vmul.f32 %v795_v3, %v407_v5 }
 0x78d   :  { %v797_v6 = vpop.eup %796 }
 0x78e   :  { %v405_v25 = vmul.f32 0.6931472, %v797_v6 }
 0x790   :  { %v411_v26 = vsel %vm410_vm6, %v408_v7, %v405_v25  ;;  %v629_v25 = vstv %s762_s13 }
 0x791   :  { %v413_v9 = vadd.f32 %v412_v8, %v411_v26 }
 0x793   :  { %756 = vmatmul.msk.f32.vlgmr.msrb.gmra.mxu3 %vm89_vm2, %v413_v9 }
 0x794   :  { %768 = vmatpush.msk.msrb.mxu3 %vm64_vm0, %v873_v0 }
 0x816   :  { %v434_v27 = vpop.f32.mrf.mxu3 }
 0x817   :  { %v435_v29 = vadd.f32 %v434_v27, %v1042_v40 }
 0x819   :  { %v440_v30 = vmul.f32 %v439_v28, %v435_v29  ;;  %v437_v31 = vmul.f32 %v435_v29, %v1046_v45 }
 0x81b   :  { %442 = vrot.lane.b32.xlu1 %v440_v30, %s831_s7  ;;  %v438_v32 = vadd.f32 %v437_v31, %v350_v60 }
 0x88d   :  { %v443_v33 = vpop.permute.xlu1 %442 }
 0x88e   :  { %v445_v34 = vadd.f32 %v443_v33, %v438_v32 }
 0x890   :  { %759 = vmatmul.msk.f32.vlgmr.msra.gmra.mxu2 %vm60_vm1, %v445_v34 }
 0x891   :  { %615 = vmatpush.msra.mxu2 %v965_v15 }
 0x893   :  { %616 = vmatpush.msra.mxu2 %v970_v16 }
 0x895   :  { %617 = vmatpush.msra.mxu2 %v977_v17 }
 0x897   :  { %618 = vmatpush.msra.mxu2 %v985_v18 }
 0x899   :  { %619 = vmatpush.msra.mxu2 %v993_v19 }
 0x89b   :  { %620 = vmatpush.msra.mxu2 %v1001_v20 }
 0x89d   :  { %621 = vmatpush.msra.mxu2 %v1009_v21 }
 0x89f   :  { %622 = vmatpush.msra.mxu2 %v1017_v22 }
 0x913   :  { %v467_v0 = vpop.f32.mrf.mxu2 }
 0x914   :  { %v468_v35 = vadd.f32 %v467_v0, %v950_v11 }
 0x916   :  { %798 = vtanh.f32 %v468_v35 }
 0x91c   :  { %v799_v36 = vpop.eup %798 }
 0x91d   :  { %760 = vmatmul.msk.f32.vlgmr.msrb.gmra.mxu0 %vm89_vm2, %v799_v36 }
 0x99a   :  { %v491_v15 = vpop.f32.mrf.mxu0 }
 0x99b   :  { %v492_v16 = vadd.f32 %v491_v15, %v1029_v23 }
 0x99d   :  { %v494_v17 = vand.u32 2147483647, %v492_v16  ;;  %v507_v43 = vmax.f32 %v492_v16, 0.0 }
 0x99f   :  { %v495_v18 = vsub.f32 0.0, %v494_v17 }
 0x9a1   :  { %v496_v37 = vmul.f32 1.442695, %v495_v18 }
 0x9a3   :  { %800 = vpow2.f32 %v496_v37 }
 0x9a9   :  { %v801_v19 = vpop.eup %800 }
 0x9aa   :  { %v498_v20 = vadd.f32 1.0, %v801_v19  ;;  %v501_v38 = vmul.f32 -0.5, %v801_v19  ;;  %v504_v22 = vand.u32 2147483647, %v801_v19 }
 0x9ac   :  { %802 = vlog2.f32 %v498_v20  ;;  %v502_v21 = vadd.f32 1.0, %v501_v38  ;;  %vm505_vm7 = vcmp.lt.f32.partialorder %v504_v22, 0.0004427343  ;;  %v724_v22 = vstv %s767_s14 }
 0x9ae   :  { %v503_v42 = vmul.f32 %v801_v19, %v502_v21 }
 0x9b2   :  { %v803_v39 = vpop.eup %802 }
 0x9b3   :  { %v500_v41 = vmul.f32 0.6931472, %v803_v39 }
 0x9b5   :  { %v506_v44 = vsel %vm505_vm7, %v503_v42, %v500_v41 }
 0x9b6   :  { %v508_v46 = vadd.f32 %v507_v43, %v506_v44 }
 0x9b8   :  { %761 = vmatmul.msk.f32.vlgmr.msrb.gmra.mxu1 %vm89_vm2, %v508_v46 }
 0xa35   :  { %v529_v47 = vpop.f32.mrf.mxu1 }
 0xa36   :  { %v530_v49 = vadd.f32 %v529_v47, %v1042_v40 }
 0xa38   :  { %v535_v50 = vmul.f32 %v534_v48, %v530_v49  ;;  %v532_v51 = vmul.f32 %v530_v49, %v1046_v45 }
 0xa3a   :  { %537 = vrot.lane.b32.xlu2 %v535_v50, %s831_s7  ;;  %v533_v52 = vadd.f32 %v532_v51, %v445_v34 }
 0xa94   :  { %v538_v53 = vpop.permute.xlu2 %537 }
 0xa95   :  { %v540_v54 = vadd.f32 %v538_v53, %v533_v52 }
 0xa97   :  { %764 = vmatmul.msk.f32.vlgmr.msrb.gmra.mxu2 %vm60_vm1, %v540_v54 }
 0xb1a   :  { %v562_v55 = vpop.f32.mrf.mxu2 }
 0xb1b   :  { %v563_v56 = vadd.f32 %v562_v55, %v950_v11 }
 0xb1d   :  { %804 = vtanh.f32 %v563_v56 }
 0xb23   :  { %v805_v57 = vpop.eup %804 }
 0xb24   :  { %765 = vmatmul.msk.f32.vlgmr.msra.gmra.mxu3 %vm89_vm2, %v805_v57 }
 0xba7   :  { %v586_v58 = vpop.f32.mrf.mxu3 }
 0xba8   :  { %v587_v59 = vadd.f32 %v586_v58, %v1029_v23 }
 0xbaa   :  { %v589_v60 = vand.u32 2147483647, %v587_v59  ;;  %v602_v4 = vmax.f32 %v587_v59, 0.0 }
 0xbac   :  { %v590_v61 = vsub.f32 0.0, %v589_v60 }
 0xbae   :  { %v591_v62 = vmul.f32 1.442695, %v590_v61 }
 0xbb0   :  { %806 = vpow2.f32 %v591_v62 }
 0xbb6   :  { %v807_v63 = vpop.eup %806 }
 0xbb7   :  { %v593_v1 = vadd.f32 1.0, %v807_v63  ;;  %v596_v10 = vmul.f32 -0.5, %v807_v63  ;;  %v599_v13 = vand.u32 2147483647, %v807_v63 }
 0xbb9   :  { %808 = vlog2.f32 %v593_v1  ;;  %v597_v12 = vadd.f32 1.0, %v596_v10  ;;  %vm600_vm8 = vcmp.lt.f32.partialorder %v599_v13, 0.0004427343 }
 0xbbb   :  { %v598_v14 = vmul.f32 %v807_v63, %v597_v12 }
 0xbbf   :  { %v809_v2 = vpop.eup %808 }
 0xbc0   :  { %v595_v3 = vmul.f32 0.6931472, %v809_v2 }
 0xbc2   :  { %v601_v5 = vsel %vm600_vm8, %v598_v14, %v595_v3 }
 0xbc3   :  { %v603_v24 = vadd.f32 %v602_v4, %v601_v5 }
 0xbc5   :  { %766 = vmatmul.msk.f32.vlgmr.msra.gmra.mxu2 %vm89_vm2, %v603_v24 }
 0xc48   :  { %v624_v6 = vpop.f32.mrf.mxu2 }
 0xc49   :  { %v625_v7 = vadd.f32 %v624_v6, %v1042_v40 }
 0xc4b   :  { %v630_v8 = vmul.f32 %v629_v25, %v625_v7  ;;  %v627_v26 = vmul.f32 %v625_v7, %v1046_v45 }
 0xc4d   :  { %632 = vrot.lane.b32.xlu2 %v630_v8, %s831_s7  ;;  %v628_v9 = vadd.f32 %v627_v26, %v540_v54 }
 0xca7   :  { %v633_v27 = vpop.permute.xlu2 %632 }
 0xca8   :  { %v635_v28 = vadd.f32 %v633_v27, %v628_v9 }
 0xcaa   :  { %769 = vmatmul.msk.f32.vlgmr.msrb.gmra.mxu3 %vm60_vm1, %v635_v28 }
 0xd2d   :  { %v657_v29 = vpop.f32.mrf.mxu3 }
 0xd2e   :  { %v658_v30 = vadd.f32 %v657_v29, %v950_v11 }
 0xd30   :  { %810 = vtanh.f32 %v658_v30 }
 0xd36   :  { %v811_v31 = vpop.eup %810 }
 0xd37   :  { %770 = vmatmul.msk.f32.vlgmr.msra.gmra.mxu1 %vm89_vm2, %v811_v31 }
 0xdb4   :  { %v681_v32 = vpop.f32.mrf.mxu1 }
 0xdb5   :  { %v682_v33 = vadd.f32 %v681_v32, %v1029_v23 }
 0xdb7   :  { %v684_v34 = vand.u32 2147483647, %v682_v33  ;;  %v697_v20 = vmax.f32 %v682_v33, 0.0 }
 0xdb9   :  { %v685_v0 = vsub.f32 0.0, %v684_v34 }
 0xdbb   :  { %v686_v35 = vmul.f32 1.442695, %v685_v0 }
 0xdbd   :  { %812 = vpow2.f32 %v686_v35 }
 0xdc3   :  { %v813_v36 = vpop.eup %812 }
 0xdc4   :  { %v688_v15 = vadd.f32 1.0, %v813_v36  ;;  %v691_v16 = vmul.f32 -0.5, %v813_v36  ;;  %v694_v18 = vand.u32 2147483647, %v813_v36 }
 0xdc6   :  { %814 = vlog2.f32 %v688_v15  ;;  %v692_v17 = vadd.f32 1.0, %v691_v16  ;;  %vm695_vm9 = vcmp.lt.f32.partialorder %v694_v18, 0.0004427343 }
 0xdc8   :  { %v693_v11 = vmul.f32 %v813_v36, %v692_v17 }
 0xdcc   :  { %v815_v37 = vpop.eup %814 }
 0xdcd   :  { %v690_v19 = vmul.f32 0.6931472, %v815_v37 }
 0xdcf   :  { %v696_v38 = vsel %vm695_vm9, %v693_v11, %v690_v19 }
 0xdd0   :  { %v698_v21 = vadd.f32 %v697_v20, %v696_v38 }
 0xdd2   :  { %771 = vmatmul.msk.f32.vlgmr.msra.gmra.mxu0 %vm89_vm2, %v698_v21 }
 0xe4f   :  { %v719_v23 = vpop.f32.mrf.mxu0 }
 0xe50   :  { %v720_v39 = vadd.f32 %v719_v23, %v1042_v40 }
 0xe52   :  { %v725_v41 = vmul.f32 %v724_v22, %v720_v39  ;;  %v722_v42 = vmul.f32 %v720_v39, %v1046_v45 }
 0xe54   :  { %727 = vrot.lane.b32.xlu0 %v725_v41, %s831_s7  ;;  %v723_v43 = vadd.f32 %v722_v42, %v635_v28 }
 0xec6   :  { %v728_v44 = vpop.permute.xlu0 %727 }
 0xec7   :  { %v730_v46 = vadd.f32 %v728_v44, %v723_v43 }
 0xec9   :  { %731 = vst.msk [vmem:[%s1170_s6] sm:$0xff] %vm60_vm1, %v730_v46 }
 0xeca   :  { %736 = vsyncpa [#allocation3], 1 }

</bundles_post_ra>
